<compile_context>
chip_gen: v5e
topology: v5e:2x2
jax: 0.10.0
libtpu: 0.0.40
codegen_flags: <defaults>
</compile_context>

<pallas_src>
import jax
import jax.numpy as jnp
from jax.experimental import pallas as pl
from jax.experimental.pallas import tpu as pltpu


def _round_up(a, b):
    return -(-a // b) * b


# ----------------------------- Pallas kernel ------------------------------- #

def _make_kernel(cin, taps, tile):
    def kernel(xa_ref, xb_ref, w_ref, b_ref, o_ref, xcol_ref):
        # xa_ref: (Cin, T) bf16  -- current lane tile of the flattened padded image
        # xb_ref: (Cin, T) bf16  -- next lane tile (covers the 2*Wgrid+2 tap halo)
        # w_ref : (Cout, 9*Cin) bf16 -- conv weights with BN scale pre-folded (f32 fold)
        # b_ref : (Cout, 1) f32      -- folded BN bias
        # o_ref : (Cout, T) bf16     -- lane-dense output tile
        # xcol_ref: (9*Cin, T) bf16 VMEM scratch (im2col columns for this tile)
        xab = jnp.concatenate([xa_ref[...], xb_ref[...]], axis=-1)   # (Cin, 2T) in vregs
        for t, off in enumerate(taps):            # static unroll: 9 static lane slices
            xcol_ref[t * cin:(t + 1) * cin, :] = xab[:, off:off + tile]
        # Single MXU matmul: (Cout, 9*Cin) @ (9*Cin, T), f32 accumulation.
        acc = jnp.dot(w_ref[...], xcol_ref[...], preferred_element_type=jnp.float32)
        # BN scale already folded into the weights -> only bias add + ReLU remain.
        o_ref[...] = jnp.maximum(acc + b_ref[...], 0.0).astype(o_ref.dtype)
    return kernel


# ------------------------------ wrapper ------------------------------------ #

def down_single_conv(x_nchw, params):
    """MaxPool2d(2) -> Conv3x3(pad=1, no bias) -> BatchNorm(eval) -> ReLU.  NCHW in/out."""
    w = params["conv_w"]                                    # (Cout, Cin, 3, 3) OIHW
    gamma, beta = params["bn_gamma"], params["bn_beta"]
    rmean, rvar, eps = params["bn_mean"], params["bn_var"], params["bn_eps"]

    B, Cin, H, W = x_nchw.shape
    Cout = w.shape[0]
    assert H % 2 == 0 and W % 2 == 0, "MaxPool2d(2) needs even spatial dims"
    Hp, Wp = H // 2, W // 2

    # ---- XLA glue: 2x2 maxpool, minimal zero-pad, fold all batches onto one lane axis --
    pooled = x_nchw.reshape(B, Cin, Hp, 2, Wp, 2).max(axis=(3, 5))      # (B,Cin,Hp,Wp)
    Wgrid = Wp + 2                       # 1 left + 1 right zero pad (minimal garbage cols)
    Hpad = Hp + 2                        # 1 top + 1 bottom zero pad
    L = Hpad * Wgrid                     # per-batch flattened slab length
    xpad = jnp.pad(pooled, ((0, 0), (0, 0), (1, 1), (1, 1)))            # (B,Cin,Hpad,Wgrid)
    xcat = jnp.transpose(xpad, (1, 0, 2, 3)).reshape(Cin, B * L).astype(jnp.bfloat16)

    # ---- lane tiling: batch folded into matmul N; "parallel" grid over lane tiles ----
    halo = 2 * Wgrid + 2                                   # max tap offset (dy=dx=2)
    T = 512 if B * L >= 512 else 256                       # per-step matmul N (>= 256)
    T = max(T, _round_up(halo, 128))                       # halo must fit in next tile
    N = _round_up(B * L, T)                                # output lanes: multiple of T(>=128)
    n_tiles = N // T
    L_in = (n_tiles + 1) * T                               # +1 tile so the halo block exists
    xflat = jnp.pad(xcat, ((0, 0), (0, L_in - B * L)))     # trailing zero lanes

    # ---- fold eval-mode BatchNorm into the conv weights (f32 fold, then bf16 cast) ----
    scale = gamma * jax.lax.rsqrt(rvar + eps)                            # (Cout,) f32
    wmat = jnp.transpose(w, (0, 2, 3, 1)).reshape(Cout, 9 * Cin)         # (O, ky,kx,I)
    wmat = (wmat * scale[:, None]).astype(jnp.bfloat16)
    bias = (beta - rmean * scale).astype(jnp.float32).reshape(Cout, 1)

    taps = tuple(dy * Wgrid + dx for dy in range(3) for dx in range(3))
    kernel = _make_kernel(Cin, taps, T)

    flops = 2 * B * Cout * 9 * Cin * Hp * Wp
    bytes_accessed = 2 * Cin * L_in + 2 * Cout * 9 * Cin + 4 * Cout + 2 * Cout * N
    vmem_bytes = (2 * 2 * (2 * Cin * T)            # two input specs, double-buffered, bf16
                  + 2 * (2 * Cout * T)             # output blocks, double-buffered, bf16
                  + 2 * 9 * Cin * T                # xcol scratch (bf16)
                  + 2 * (2 * Cout * 9 * Cin + 4 * Cout))   # weights + bias
    vmem_limit = int(min(64 * 1024 * 1024, max(4 * 1024 * 1024, 4 * vmem_bytes)))

    out = pl.pallas_call(
        kernel,
        out_shape=jax.ShapeDtypeStruct((Cout, N), jnp.bfloat16),
        grid_spec=pltpu.PrefetchScalarGridSpec(
            num_scalar_prefetch=0,
            grid=(n_tiles,),
            in_specs=[
                pl.BlockSpec((Cin, T), lambda j: (0, j)),         # current lane tile
                pl.BlockSpec((Cin, T), lambda j: (0, j + 1)),     # next tile (tap halo)
                pl.BlockSpec((Cout, 9 * Cin), lambda j: (0, 0)),  # BN-folded weights
                pl.BlockSpec((Cout, 1), lambda j: (0, 0)),        # BN bias
            ],
            out_specs=pl.BlockSpec((Cout, T), lambda j: (0, j)),
            scratch_shapes=[pltpu.VMEM((9 * Cin, T), jnp.bfloat16)],
        ),
        compiler_params=pltpu.CompilerParams(
            dimension_semantics=("parallel",),
            vmem_limit_bytes=vmem_limit,
        ),
        cost_estimate=pl.CostEstimate(flops=flops, transcendentals=0,
                                      bytes_accessed=int(bytes_accessed)),
    )(xflat, xflat, wmat, bias)

    # Un-flatten: drop the (small) per-batch pad rows/cols and return NCHW in the input
    # dtype.  This is one fused XLA slice+transpose+cast pass over bf16 data.
    y = out[:, :B * L].reshape(Cout, B, Hpad, Wgrid)[:, :, :Hp, :Wp]
    return jnp.transpose(y, (1, 0, 2, 3)).astype(x_nchw.dtype)


# -------------------------- parameters & reference -------------------------- #

def init_params(key, in_channels, out_channels):
    k1, k2, k3, k4, k5 = jax.random.split(key, 5)
    fan_in = 9 * in_channels
    w = jax.random.normal(k1, (out_channels, in_channels, 3, 3), jnp.float32) * (2.0 / fan_in) ** 0.5
    gamma = 1.0 + 0.1 * jax.random.normal(k2, (out_channels,), jnp.float32)
    beta = 0.1 * jax.random.normal(k3, (out_channels,), jnp.float32)
    rmean = 0.1 * jax.random.normal(k4, (out_channels,), jnp.float32)
    rvar = jnp.abs(1.0 + 0.1 * jax.random.normal(k5, (out_channels,), jnp.float32))
    return {"conv_w": w, "bn_gamma": gamma, "bn_beta": beta,
            "bn_mean": rmean, "bn_var": rvar, "bn_eps": 1e-5}


def reference_forward(x_nchw, params):
    B, Cin, H, W = x_nchw.shape
    pooled = x_nchw.reshape(B, Cin, H // 2, 2, W // 2, 2).max(axis=(3, 5))
    y = jax.lax.conv_general_dilated(
        pooled, params["conv_w"], (1, 1), "SAME",
        dimension_numbers=("NCHW", "OIHW", "NCHW"),
        precision=jax.lax.Precision.HIGHEST)
    scale = params["bn_gamma"] / jnp.sqrt(params["bn_var"] + params["bn_eps"])
    bias = params["bn_beta"] - params["bn_mean"] * scale
    y = y * scale[None, :, None, None] + bias[None, :, None, None]
    return jnp.maximum(y, 0.0)


# -------------------------------- main -------------------------------------- #

if __name__ == "__main__":
    B, in_channels, H, W = 2, 4, 16, 16
    out_channels = 32

    key = jax.random.PRNGKey(0)
    key, kx = jax.random.split(key)
    x = jax.random.normal(kx, (B, in_channels, H, W), jnp.float32)   # NCHW like PyTorch
    params = init_params(key, in_channels, out_channels)

    fwd = jax.jit(down_single_conv)
    out = jax.block_until_ready(fwd(x, params))
    ref = jax.block_until_ready(reference_forward(x, params))

    assert out.shape == (B, out_channels, H // 2, W // 2), out.shape
    max_err = float(jnp.max(jnp.abs(out - ref)))
    assert jnp.allclose(out, ref, atol=5e-2, rtol=5e-2), f"max abs err {max_err}"
    print("KERNEL_OK")
</pallas_src>

<mosaic_0001>
module attributes {stable_mosaic.version = 11 : i64} {
  func.func @kernel(%arg0: i32, %arg1: memref<4x256xbf16, #tpu.memory_space<vmem>>, %arg2: memref<4x256xbf16, #tpu.memory_space<vmem>>, %arg3: memref<32x36xbf16, #tpu.memory_space<vmem>>, %arg4: memref<32x1xf32, #tpu.memory_space<vmem>>, %arg5: memref<32x256xbf16, #tpu.memory_space<vmem>>, %arg6: memref<36x256xbf16, #tpu.memory_space<vmem>>) attributes {dimension_semantics = [#tpu.dimension_semantics<parallel>], iteration_bounds = array<i64: 1>, scalar_prefetch = 0 : i64, scratch_operands = 1 : i64, tpu.core_type = #tpu.core_type<tc>, window_params = [{transform_indices = @transform_0, window_bounds = array<i64: 4, 256>}, {transform_indices = @transform_1, window_bounds = array<i64: 4, 256>}, {pipeline_mode = #tpu.pipeline_mode<synchronous>, transform_indices = @transform_2, window_bounds = array<i64: 32, 36>}, {pipeline_mode = #tpu.pipeline_mode<synchronous>, transform_indices = @transform_3, window_bounds = array<i64: 32, 1>}, {transform_indices = @transform_4, window_bounds = array<i64: 32, 256>}]} {
    %c0 = arith.constant 0 : index
    %c0_0 = arith.constant 0 : index
    %0 = vector.load %arg1[%c0, %c0_0] : memref<4x256xbf16, #tpu.memory_space<vmem>>, vector<4x256xbf16>
    %c0_1 = arith.constant 0 : index
    %c0_2 = arith.constant 0 : index
    %1 = vector.load %arg2[%c0_1, %c0_2] : memref<4x256xbf16, #tpu.memory_space<vmem>>, vector<4x256xbf16>
    %2 = tpu.concatenate %0, %1 in 1 : vector<4x256xbf16>, vector<4x256xbf16> -> vector<4x512xbf16>
    %3 = vector.extract_strided_slice %2 {offsets = [0, 0], sizes = [4, 256], strides = [1, 1]} : vector<4x512xbf16> to vector<4x256xbf16>
    %c0_3 = arith.constant 0 : index
    %c0_4 = arith.constant 0 : index
    %4 = vector.load %arg6[%c0_3, %c0_4] : memref<36x256xbf16, #tpu.memory_space<vmem>>, vector<4x256xbf16>
    tpu.vector_store %arg6[%c0_3, %c0_4], %3 {strides = array<i32>} : memref<36x256xbf16, #tpu.memory_space<vmem>>, vector<4x256xbf16>,
    %5 = vector.extract_strided_slice %2 {offsets = [0, 1], sizes = [4, 256], strides = [1, 1]} : vector<4x512xbf16> to vector<4x256xbf16>
    %c4 = arith.constant 4 : index
    %c0_5 = arith.constant 0 : index
    %6 = vector.load %arg6[%c4, %c0_5] : memref<36x256xbf16, #tpu.memory_space<vmem>>, vector<4x256xbf16>
    tpu.vector_store %arg6[%c4, %c0_5], %5 {strides = array<i32>} : memref<36x256xbf16, #tpu.memory_space<vmem>>, vector<4x256xbf16>,
    %7 = vector.extract_strided_slice %2 {offsets = [0, 2], sizes = [4, 256], strides = [1, 1]} : vector<4x512xbf16> to vector<4x256xbf16>
    %c8 = arith.constant 8 : index
    %c0_6 = arith.constant 0 : index
    %8 = vector.load %arg6[%c8, %c0_6] : memref<36x256xbf16, #tpu.memory_space<vmem>>, vector<4x256xbf16>
    tpu.vector_store %arg6[%c8, %c0_6], %7 {strides = array<i32>} : memref<36x256xbf16, #tpu.memory_space<vmem>>, vector<4x256xbf16>,
    %9 = vector.extract_strided_slice %2 {offsets = [0, 10], sizes = [4, 256], strides = [1, 1]} : vector<4x512xbf16> to vector<4x256xbf16>
    %c12 = arith.constant 12 : index
    %c0_7 = arith.constant 0 : index
    %10 = vector.load %arg6[%c12, %c0_7] : memref<36x256xbf16, #tpu.memory_space<vmem>>, vector<4x256xbf16>
    tpu.vector_store %arg6[%c12, %c0_7], %9 {strides = array<i32>} : memref<36x256xbf16, #tpu.memory_space<vmem>>, vector<4x256xbf16>,
    %11 = vector.extract_strided_slice %2 {offsets = [0, 11], sizes = [4, 256], strides = [1, 1]} : vector<4x512xbf16> to vector<4x256xbf16>
    %c16 = arith.constant 16 : index
    %c0_8 = arith.constant 0 : index
    %12 = vector.load %arg6[%c16, %c0_8] : memref<36x256xbf16, #tpu.memory_space<vmem>>, vector<4x256xbf16>
    tpu.vector_store %arg6[%c16, %c0_8], %11 {strides = array<i32>} : memref<36x256xbf16, #tpu.memory_space<vmem>>, vector<4x256xbf16>,
    %13 = vector.extract_strided_slice %2 {offsets = [0, 12], sizes = [4, 256], strides = [1, 1]} : vector<4x512xbf16> to vector<4x256xbf16>
    %c20 = arith.constant 20 : index
    %c0_9 = arith.constant 0 : index
    %14 = vector.load %arg6[%c20, %c0_9] : memref<36x256xbf16, #tpu.memory_space<vmem>>, vector<4x256xbf16>
    tpu.vector_store %arg6[%c20, %c0_9], %13 {strides = array<i32>} : memref<36x256xbf16, #tpu.memory_space<vmem>>, vector<4x256xbf16>,
    %15 = vector.extract_strided_slice %2 {offsets = [0, 20], sizes = [4, 256], strides = [1, 1]} : vector<4x512xbf16> to vector<4x256xbf16>
    %c24 = arith.constant 24 : index
    %c0_10 = arith.constant 0 : index
    %16 = vector.load %arg6[%c24, %c0_10] : memref<36x256xbf16, #tpu.memory_space<vmem>>, vector<4x256xbf16>
    tpu.vector_store %arg6[%c24, %c0_10], %15 {strides = array<i32>} : memref<36x256xbf16, #tpu.memory_space<vmem>>, vector<4x256xbf16>,
    %17 = vector.extract_strided_slice %2 {offsets = [0, 21], sizes = [4, 256], strides = [1, 1]} : vector<4x512xbf16> to vector<4x256xbf16>
    %c28 = arith.constant 28 : index
    %c0_11 = arith.constant 0 : index
    %18 = vector.load %arg6[%c28, %c0_11] : memref<36x256xbf16, #tpu.memory_space<vmem>>, vector<4x256xbf16>
    tpu.vector_store %arg6[%c28, %c0_11], %17 {strides = array<i32>} : memref<36x256xbf16, #tpu.memory_space<vmem>>, vector<4x256xbf16>,
    %19 = vector.extract_strided_slice %2 {offsets = [0, 22], sizes = [4, 256], strides = [1, 1]} : vector<4x512xbf16> to vector<4x256xbf16>
    %c32 = arith.constant 32 : index
    %c0_12 = arith.constant 0 : index
    %20 = vector.load %arg6[%c32, %c0_12] : memref<36x256xbf16, #tpu.memory_space<vmem>>, vector<4x256xbf16>
    tpu.vector_store %arg6[%c32, %c0_12], %19 {strides = array<i32>} : memref<36x256xbf16, #tpu.memory_space<vmem>>, vector<4x256xbf16>,
    %c0_13 = arith.constant 0 : index
    %c0_14 = arith.constant 0 : index
    %21 = vector.load %arg3[%c0_13, %c0_14] : memref<32x36xbf16, #tpu.memory_space<vmem>>, vector<32x36xbf16>
    %c0_15 = arith.constant 0 : index
    %c0_16 = arith.constant 0 : index
    %22 = vector.load %arg6[%c0_15, %c0_16] : memref<36x256xbf16, #tpu.memory_space<vmem>>, vector<36x256xbf16>
    %cst = arith.constant dense<0.000000e+00> : vector<32x256xf32>
    %23 = tpu.matmul %21, %22, %cst {dimension_numbers = #tpu.dot_dimension_numbers<[1], [0], [0], [1], [0, 0, 1, 1], [], []>} : vector<32x36xbf16>, vector<36x256xbf16>, vector<32x256xf32> -> vector<32x256xf32>
    %c0_17 = arith.constant 0 : index
    %c0_18 = arith.constant 0 : index
    %24 = vector.load %arg4[%c0_17, %c0_18] : memref<32x1xf32, #tpu.memory_space<vmem>>, vector<32x1xf32>
    %25 = vector.broadcast %24 : vector<32x1xf32> to vector<32x256xf32>
    %26 = arith.addf %23, %25 : vector<32x256xf32>
    %cst_19 = arith.constant 0.000000e+00 : f32
    %27 = vector.broadcast %cst_19 : f32 to vector<32x256xf32>
    %28 = arith.maximumf %26, %27 : vector<32x256xf32>
    %29 = arith.truncf %28 : vector<32x256xf32> to vector<32x256xbf16>
    %c0_20 = arith.constant 0 : index
    %c0_21 = arith.constant 0 : index
    %30 = vector.load %arg5[%c0_20, %c0_21] : memref<32x256xbf16, #tpu.memory_space<vmem>>, vector<32x256xbf16>
    tpu.vector_store %arg5[%c0_20, %c0_21], %29 {strides = array<i32>} : memref<32x256xbf16, #tpu.memory_space<vmem>>, vector<32x256xbf16>,
    return
  }
  func.func @transform_0(%arg0: i32) -> (i32, i32) {
    %c0_i32 = arith.constant 0 : i32
    %c0_i32_0 = arith.constant 0 : i32
    return %c0_i32, %arg0 : i32, i32
  }
  func.func @transform_1(%arg0: i32) -> (i32, i32) {
    %c1_i32 = arith.constant 1 : i32
    %0 = arith.addi %arg0, %c1_i32 : i32
    %c0_i32 = arith.constant 0 : i32
    %c0_i32_0 = arith.constant 0 : i32
    return %c0_i32, %0 : i32, i32
  }
  func.func @transform_2(%arg0: i32) -> (i32, i32) {
    %c0_i32 = arith.constant 0 : i32
    %c0_i32_0 = arith.constant 0 : i32
    %c0_i32_1 = arith.constant 0 : i32
    return %c0_i32, %c0_i32_0 : i32, i32
  }
  func.func @transform_3(%arg0: i32) -> (i32, i32) {
    %c0_i32 = arith.constant 0 : i32
    %c0_i32_0 = arith.constant 0 : i32
    %c0_i32_1 = arith.constant 0 : i32
    return %c0_i32, %c0_i32_0 : i32, i32
  }
  func.func @transform_4(%arg0: i32) -> (i32, i32) {
    %c0_i32 = arith.constant 0 : i32
    %c0_i32_0 = arith.constant 0 : i32
    return %c0_i32, %arg0 : i32, i32
  }
}

</mosaic_0001>

<bundles_post_ra>
// kernel: down_single_conv.1
= control target key start
LH: loop header
LB: loop body
LE: loop exit
PB: predicated region body
PF: predicated region fallthrough
CT: control target
= control target key end

     0   :  { %s349_s19 = smov 117   ;;  %s350_s20 = smov 106   ;;  %vm67_vm0 = vcmask 1043456   ;;  %vm113_vm1 = vcmask 949248   ;;  %vm102_vm2 = vcmask 957440   ;;  %vm124_vm3 = vcmask 883712   ;;  %s427_s0 = inlined_call_operand.vmem [shape: bf16[4,512], index: 0, kind: input, shape index: {}, may-alias: {0,1}]   ;;  %s428_s1 = inlined_call_operand.vmem [shape: bf16[4,512], index: 1, kind: input, shape index: {}, may-alias: {0,1}]   ;;  %s429_s3 = inlined_call_operand.vmem [shape: f32[32,1], index: 3, kind: input, shape index: {}]   ;;  %s430_s2 = inlined_call_operand.vmem [shape: bf16[32,36], index: 2, kind: input, shape index: {}]   ;;  %s431_s4 = inlined_call_operand.vmem [shape: bf16[32,256], index: 4, kind: output, shape index: {}]  }
   0x1   :  { %v40_v0 = vld [vmem:[%s427_s0] sm:$0xf]  ;;  %v296_v1 = vld [vmem:[%s428_s1 + $0x4] sm:$0xf]  ;;  %s351_s21 = smov 116   ;;  %s352_s0 = smov 108  }
   0x2   :  { %43 = vst [vmem:[#allocation1] ss:$4 sm:$0xff] %v40_v0  ;;  %s353_s1 = smov 107   ;;  %s354_s22 = smov 127   ;;  %vm146_vm4 = vcmask 867328   ;;  %vm135_vm5 = vcmask 875520  }
   0x3   :  { %s355_s23 = smov 126   ;;  %s356_s24 = smov 118   ;;  %vm69_vm6 = vcmask 1039360   ;;  %v159_v46 = vld [vmem:[%s429_s3] sm:$0xff]  ;;  %v161_v47 = vld [vmem:[%s429_s3 + $0x10] sm:$0xff]  ;;  %v357_v50 = vmov 0  }
   0x4   :  { %346 = vset.pattern.permute.xlu1 %v357_v50  ;;  %348 = vset.pattern.permute.xlu0 %v357_v50  ;;  %v160_v51 = vld [vmem:[%s429_s3 + $0x8] sm:$0xff]  ;;  %vm225_vm7 = vcmask 1041408   ;;  %vm80_vm8 = vcmask 1031168   ;;  %v162_v63 = vld [vmem:[%s429_s3 + $0x18] sm:$0xff]  ;;  %vm91_vm9 = vcmask 965632   ;;  %vm218_vm10 = vcmask 293888  }
   0x5   :  { %347 = vset.pattern.permute.xlu2 %v357_v50 }
   0x9   :  { %v44_v2 = vld.sshfl [vmem:[#allocation1] sm:$0xff pattern:$0x73625140]  ;;  %v46_v3 = vld.sshfl [vmem:[#allocation1 + $0x8] sm:$0xff pattern:$0x73625140] }
   0xa   :  { %v52_v4 = vunpack.c.l.b16 %v44_v2  ;;  %v53_v5 = vunpack.c.l.b16 %v46_v3  ;;  %49 = vst [vmem:[#allocation1] ss:$4 sm:$0xff] %v296_v1 }
   0xc   :  { %v54_v6 = vpack.c.b16 %v53_v5, %v52_v4 }
   0xe   :  { %95 = vrot.lane.b32.xlu1 %v54_v6, %s349_s19  ;;  %56 = vst [vmem:[#allocation2] sm:$0x33] %v54_v6  ;;  %139 = vrot.lane.b32.xlu0 %v54_v6, %s350_s20  ;;  %v59_v7 = vrot.slane %v54_v6, 6 }
  0x10   :  { %106 = vrot.lane.b32.xlu2 %v59_v7, %s351_s21 }
  0x11   :  { %v50_v8 = vld.sshfl [vmem:[#allocation1] sm:$0xff pattern:$0x73625140] }
  0x12   :  { %v57_v9 = vunpack.c.l.b16 %v50_v8 }
  0x14   :  { %v58_v10 = vpack.c.b16 %v57_v9, %v57_v9 }
  0x16   :  { %117 = vrot.lane.b32.xlu0 %v54_v6, %s352_s0  ;;  %97 = vrot.lane.b32.xlu1 %v58_v10, %s349_s19  ;;  %v60_v11 = vrot.slane %v58_v10, 6 }
  0x18   :  { %128 = vrot.lane.b32.xlu2 %v59_v7, %s353_s1 }
  0x1e   :  { %119 = vrot.lane.b32.xlu1 %v58_v10, %s352_s0  ;;  %141 = vrot.lane.b32.xlu0 %v58_v10, %s350_s20 }
  0x20   :  { %108 = vrot.lane.b32.xlu2 %v60_v11, %s351_s21 }
  0x26   :  { %61 = vrot.lane.b32.xlu1 %v59_v7, %s354_s22  ;;  %130 = vrot.lane.b32.xlu0 %v60_v11, %s353_s1 }
  0x28   :  { %63 = vrot.lane.b32.xlu2 %v60_v11, %s354_s22 }
  0x2e   :  { %75 = vrot.lane.b32.xlu1 %v58_v10, %s355_s23  ;;  %73 = vrot.lane.b32.xlu0 %v54_v6, %s355_s23 }
  0x30   :  { %84 = vrot.lane.b32.xlu2 %v59_v7, %s356_s24 }
  0x36   :  { %86 = vrot.lane.b32.xlu0 %v60_v11, %s356_s24  ;;  %165 = vperm.xlu1 %346, %v159_v46  }
  0x38   :  { %170 = vperm.xlu2 %347, %v160_v51  }
  0x3e   :  { %175 = vperm.xlu0 %348, %v161_v47   ;;  %180 = vperm.xlu1 %346, %v162_v63  }
  0x6a   :  { %v107_v12 = vpop.permute.xlu2 %106 }
  0x6b   :  { %v110_v14 = vrot.slane %v107_v12, 4 }
  0x72   :  { %v129_v13 = vpop.permute.xlu2 %128 }
  0x73   :  { %v132_v39 = vrot.slane %v129_v13, 4 }
  0x7a   :  { %v109_v15 = vpop.permute.xlu2 %108 }
  0x7b   :  { %v111_v16 = vrot.slane %v109_v15, 4 }
  0x7d   :  { %v112_v17 = vsel %vm67_vm0, %v110_v14, %v111_v16 }
  0x7e   :  { %v114_v18 = vsel %vm113_vm1, %v107_v12, %v112_v17 }
  0x7f   :  { %116 = vst [vmem:[#allocation2 + $0x10] sm:$0xcc] %v114_v18 }
  0x80   :  { %v96_v19 = vpop.permute.xlu1 %95  ;;  %v140_v20 = vpop.permute.xlu0 %139 }
  0x81   :  { %v99_v21 = vrot.slane %v96_v19, 4  ;;  %v143_v29 = vrot.slane %v140_v20, 4 }
  0x82   :  { %v64_v37 = vpop.permute.xlu2 %63 }
  0x83   :  { %v66_v38 = vrot.slane %v64_v37, 4 }
  0x88   :  { %v118_v22 = vpop.permute.xlu0 %117  ;;  %v98_v23 = vpop.permute.xlu1 %97 }
  0x89   :  { %v100_v24 = vrot.slane %v98_v23, 4  ;;  %v121_v30 = vrot.slane %v118_v22, 4 }
  0x8a   :  { %v85_v6 = vpop.permute.xlu2 %84 }
  0x8b   :  { %v101_v25 = vsel %vm67_vm0, %v99_v21, %v100_v24  ;;  %v88_v9 = vrot.slane %v85_v6, 4  ;;  %v326_v21 = vld [vmem:[%s430_s2 + $0x8] sm:$0xff] }
  0x8c   :  { %v103_v26 = vsel %vm102_vm2, %v96_v19, %v101_v25 }
  0x8d   :  { %105 = vst [vmem:[#allocation2 + $0x10] sm:$0x33] %v103_v26 }
  0x90   :  { %v120_v27 = vpop.permute.xlu1 %119  ;;  %v142_v28 = vpop.permute.xlu0 %141 }
  0x91   :  { %v122_v31 = vrot.slane %v120_v27, 4  ;;  %v144_v32 = vrot.slane %v142_v28, 4 }
  0x93   :  { %v123_v33 = vsel %vm67_vm0, %v121_v30, %v122_v31  ;;  %v145_v34 = vsel %vm67_vm0, %v143_v29, %v144_v32  ;;  %v171_v32 = vpop.permute.xlu2 %170 }
  0x94   :  { %v125_v35 = vsel %vm124_vm3, %v118_v22, %v123_v33  ;;  %v147_v36 = vsel %vm146_vm4, %v140_v20, %v145_v34  ;;  %v315_v1 = vld [vmem:[#allocation2 + $0x10] sm:$0xf]  ;;  %v329_v4 = vld [vmem:[#allocation2 + $0x14] sm:$0xf]  ;;  %v325_v20 = vld [vmem:[%s430_s2] sm:$0xff] }
  0x95   :  { %127 = vst [vmem:[#allocation2 + $0x18] sm:$0x33] %v125_v35 }
  0x96   :  { %149 = vst [vmem:[#allocation2 + $0x20] sm:$0x33] %v147_v36 }
  0x98   :  { %v62_v40 = vpop.permute.xlu1 %61  ;;  %v131_v41 = vpop.permute.xlu0 %130 }
  0x99   :  { %v65_v42 = vrot.slane %v62_v40, 4  ;;  %v133_v43 = vrot.slane %v131_v41, 4 }
  0x9b   :  { %v134_v44 = vsel %vm67_vm0, %v132_v39, %v133_v43  ;;  %v68_v45 = vsel %vm67_vm0, %v65_v42, %v66_v38 }
  0x9c   :  { %v136_v48 = vsel %vm135_vm5, %v129_v13, %v134_v44  ;;  %v70_v49 = vsel %vm69_vm6, %v62_v40, %v68_v45 }
  0x9d   :  { %138 = vst [vmem:[#allocation2 + $0x18] sm:$0xcc] %v136_v48  ;;  %v158_v52 = vld [vmem:[#allocation2 + $0x20] sm:$0x33] }
  0x9e   :  { %72 = vst [vmem:[#allocation2] sm:$0xcc] %v70_v49  ;;  %v206_v53 = vunpack.c.l.b16 %v158_v52  ;;  %v207_v54 = vunpack.c.h.b16 %v158_v52 }
  0xa0   :  { %v76_v55 = vpop.permute.xlu1 %75  ;;  %v74_v56 = vpop.permute.xlu0 %73  ;;  %v212_v57 = vpack.c.b16 %v206_v53, %v206_v53  ;;  %v213_v58 = vpack.c.b16 %v207_v54, %v207_v54 }
  0xa1   :  { %v78_v59 = vrot.slane %v76_v55, 4  ;;  %v77_v60 = vrot.slane %v74_v56, 4 }
  0xa2   :  { %v227_v61 = vsel %vm225_vm7, %v212_v57, 0  ;;  %v230_v62 = vsel %vm225_vm7, %v213_v58, 0 }
  0xa3   :  { %v79_v0 = vsel %vm67_vm0, %v77_v60, %v78_v59  ;;  %237 = vmatpush.bf16.msra.mxu0 %v227_v61  ;;  %331 = vmatpush.bf16.msra.mxu2 %v227_v61 }
  0xa4   :  { %v81_v2 = vsel %vm80_vm8, %v74_v56, %v79_v0  ;;  %256 = vmatpush.bf16.msra.mxu1 %v230_v62  ;;  %334 = vmatpush.bf16.msra.mxu3 %v230_v62  ;;  %v330_v3 = vld [vmem:[#allocation2 + $0x14] sm:$0xf0]  ;;  %v317_v5 = vld [vmem:[#allocation2 + $0x18] sm:$0xf0] }
  0xa5   :  { %83 = vst [vmem:[#allocation2 + $0x8] sm:$0x33] %v81_v2  ;;  %v316_v7 = vor.u32 %v330_v3, %v315_v1  ;;  %v320_v8 = vor.u32 %v329_v4, %v317_v5  ;;  %v307_v14 = vld [vmem:[#allocation2] sm:$0xf]  ;;  %v327_v16 = vld [vmem:[#allocation2 + $0x4] sm:$0xf] }
  0xa7   :  { %238 = vmatpush.bf16.msra.mxu0 %v316_v7  ;;  %332 = vmatpush.bf16.msra.mxu2 %v316_v7 }
  0xa8   :  { %257 = vmatpush.bf16.msra.mxu1 %v320_v8  ;;  %335 = vmatpush.bf16.msra.mxu3 %v320_v8  ;;  %v87_v10 = vpop.permute.xlu0 %86  ;;  %v166_v22 = vpop.permute.xlu1 %165 }
  0xa9   :  { %v89_v11 = vrot.slane %v87_v10, 4 }
  0xab   :  { %v90_v12 = vsel %vm67_vm0, %v88_v9, %v89_v11 }
  0xac   :  { %v92_v13 = vsel %vm91_vm9, %v85_v6, %v90_v12 }
  0xad   :  { %94 = vst [vmem:[#allocation2 + $0x8] sm:$0xcc] %v92_v13 }
  0xb0   :  { %v176_v29 = vpop.permute.xlu0 %175  ;;  %v181_v45 = vpop.permute.xlu1 %180 }
  0xb4   :  { %v328_v15 = vld [vmem:[#allocation2 + $0x4] sm:$0xf0]  ;;  %v309_v17 = vld [vmem:[#allocation2 + $0x8] sm:$0xf0] }
  0xb5   :  { %v308_v18 = vor.u32 %v328_v15, %v307_v14  ;;  %v312_v19 = vor.u32 %v327_v16, %v309_v17 }
  0xb7   :  { %239 = vmatpush.bf16.msra.mxu0 %v308_v18  ;;  %333 = vmatpush.bf16.msra.mxu2 %v308_v18 }
  0xb8   :  { %258 = vmatpush.bf16.msra.mxu1 %v312_v19  ;;  %336 = vmatpush.bf16.msra.mxu3 %v312_v19 }
  0xba   :  { %321 = vmatmul.msk.bf16.vlgmr.msra.gmra.mxu0 %vm218_vm10, %v325_v20  ;;  %322 = vmatmul.msk.bf16.vlgmr.msra.gmra.mxu2 %vm218_vm10, %v326_v21 }
  0xbb   :  { %323 = vmatmul.msk.bf16.vlgmr.msra.gmra.mxu1 %vm218_vm10, %v325_v20  ;;  %324 = vmatmul.msk.bf16.vlgmr.msra.gmra.mxu3 %vm218_vm10, %v326_v21 }
 0x137   :  { %v241_v23 = vpop.f32.mrf.mxu0 }
 0x138   :  { %v242_v24 = vadd.f32 %v241_v23, %v166_v22  ;;  %v260_v25 = vpop.f32.mrf.mxu1 }
 0x139   :  { %v261_v26 = vadd.f32 %v260_v25, %v166_v22 }
 0x13a   :  { %v270_v27 = vmax.f32 %v242_v24, 0.0 }
 0x13b   :  { %v271_v28 = vmax.f32 %v261_v26, 0.0 }
 0x13d   :  { %v278_v30 = vpack.c.bf16 %v271_v28, %v270_v27  ;;  %v246_v31 = vpop.f32.mrf.mxu2 }
 0x13e   :  { %v247_v33 = vadd.f32 %v246_v31, %v176_v29  ;;  %v265_v34 = vpop.f32.mrf.mxu3 }
 0x13f   :  { %282 = vst [vmem:[%s431_s4] sm:$0xff] %v278_v30  ;;  %v266_v35 = vadd.f32 %v265_v34, %v176_v29  ;;  %v243_v36 = vpop.f32.mrf.mxu0 }
 0x140   :  { %v274_v37 = vmax.f32 %v247_v33, 0.0  ;;  %v262_v38 = vpop.f32.mrf.mxu1  ;;  %v244_v39 = vadd.f32 %v243_v36, %v171_v32 }
 0x141   :  { %v275_v40 = vmax.f32 %v266_v35, 0.0  ;;  %v263_v41 = vadd.f32 %v262_v38, %v171_v32 }
 0x142   :  { %v272_v42 = vmax.f32 %v244_v39, 0.0 }
 0x143   :  { %v280_v43 = vpack.c.bf16 %v275_v40, %v274_v37  ;;  %v273_v44 = vmax.f32 %v263_v41, 0.0 }
 0x145   :  { %284 = vst [vmem:[%s431_s4 + $0x10] sm:$0xff] %v280_v43  ;;  %v279_v46 = vpack.c.bf16 %v273_v44, %v272_v42  ;;  %v248_v47 = vpop.f32.mrf.mxu2 }
 0x146   :  { %v249_v48 = vadd.f32 %v248_v47, %v181_v45  ;;  %v267_v49 = vpop.f32.mrf.mxu3 }
 0x147   :  { %283 = vst [vmem:[%s431_s4 + $0x8] sm:$0xff] %v279_v46  ;;  %v268_v50 = vadd.f32 %v267_v49, %v181_v45 }
 0x148   :  { %v276_v51 = vmax.f32 %v249_v48, 0.0 }
 0x149   :  { %v277_v52 = vmax.f32 %v268_v50, 0.0 }
 0x14b   :  { %v281_v53 = vpack.c.bf16 %v277_v52, %v276_v51 }
 0x14d   :  { %285 = vst [vmem:[%s431_s4 + $0x18] sm:$0xff] %v281_v53 }

</bundles_post_ra>
